<compile_context>
chip_gen: v7x
topology: tpu7x:2x2x1
jax: 0.10.0
libtpu: 0.0.40
codegen_flags: <defaults>
</compile_context>

<pallas_src>
import functools
import math

import jax
import jax.numpy as jnp
from jax import lax
from jax.experimental import pallas as pl
from jax.experimental.pallas import tpu as pltpu


_NEG_BIG = -1e30  # finite "-inf": masked rows can never introduce NaNs into the online softmax


def _make_attn_kernel(dim, batch, block_rows, tiles_per_split):
    inv_sqrt_dim = 1.0 / math.sqrt(float(dim))

    def kernel(t1_ref, t2_ref, m_out_ref, l_out_ref, acc_out_ref, m_sc, l_sc, acc_sc):
        s = pl.program_id(0)   # split (one per TensorCore on v7x via "parallel")
        t = pl.program_id(1)   # batch tile within the split ("arbitrary": online-softmax reduction)

        @pl.when(t == 0)
        def _init():
            m_sc[...] = jnp.full_like(m_sc, _NEG_BIG)
            l_sc[...] = jnp.zeros_like(l_sc)
            acc_sc[...] = jnp.zeros_like(acc_sc)

        # Single f32 path (no bf16 VALU on v5e; kernel is HBM-bound so f32 compute is free).
        t1 = t1_ref[...].astype(jnp.float32)          # (TB, D)
        t2 = t2_ref[...].astype(jnp.float32)          # (TB, D)

        # Global row ids of this tile; rows >= batch belong to the padded tail / clamped overrun
        # tiles and are masked out of every reduction below.
        row0 = (s * tiles_per_split + t) * block_rows
        rows = row0 + lax.broadcasted_iota(jnp.int32, (block_rows, 1), 0)
        valid = rows < batch                          # (TB, 1)

        # Per-row scaled dot product (the bmm); f32 accumulation fused into the lane reduction.
        scores = jnp.sum(t1 * t2, axis=-1, keepdims=True, dtype=jnp.float32) * inv_sqrt_dim
        scores = jnp.where(valid, scores, _NEG_BIG)   # (TB, 1)

        # Online softmax over the batch (sublane) axis.
        m_prev = m_sc[...]                                                   # (1, 1)
        m_new = jnp.maximum(m_prev, jnp.max(scores, axis=0, keepdims=True))  # (1, 1)
        alpha = jnp.exp(m_prev - m_new)
        p = jnp.where(valid, jnp.exp(scores - m_new), 0.0)                   # (TB, 1)

        combined = jnp.where(valid, t1 + t2, 0.0)                            # (TB, D)
        l_sc[...] = alpha * l_sc[...] + jnp.sum(p, axis=0, keepdims=True)
        acc_sc[...] = alpha * acc_sc[...] + jnp.sum(p * combined, axis=0, keepdims=True)
        m_sc[...] = m_new

        @pl.when(t == pl.num_programs(1) - 1)
        def _finalize():
            m_out_ref[0, :, :] = m_sc[...]
            l_out_ref[0, :, :] = l_sc[...]
            acc_out_ref[0, :, :] = acc_sc[...]

    return kernel


def custom_attention_layer(tensor1, tensor2, dim, *, block_rows=None, num_splits=None):
    """Pallas TPU implementation of CustomAttentionLayer.forward.

    tensor1, tensor2: (B, D) arrays. Returns a (D,) array with the input dtype.
    """
    B, D = tensor1.shape
    assert tensor2.shape == (B, D)
    in_dtype = tensor1.dtype
    itemsize = jnp.dtype(in_dtype).itemsize

    # Batch tile: ~2 MiB per input block (near the HBM-roofline sweet spot for tiled mem-bound
    # kernels), multiple of 8 sublanes, never larger than B.
    if block_rows is None:
        block_rows = max(8, min(1024, ((2 << 20) // max(D * itemsize, 1)) // 8 * 8))
    TB = B if B <= block_rows else block_rows
    total_tiles = -(-B // TB)

    # One split per TensorCore (v7x has 2 TCs; single-TC chips just run the splits sequentially).
    if num_splits is None:
        num_splits = 2 if total_tiles >= 2 else 1
    S = max(1, min(num_splits, total_tiles))
    T = -(-total_tiles // S)   # batch tiles per split

    kernel = _make_attn_kernel(dim, B, TB, T)

    def in_map(s, t):
        # Clamp overrun tiles (when total_tiles % S != 0) onto a valid tile; the kernel masks
        # their rows out (rows >= B), so the duplicate read contributes nothing.
        return (jnp.minimum(s * T + t, total_tiles - 1), 0)

    out_map = lambda s, t: (s, 0, 0)

    # TODO(synk): if profiling on v7x shows exposed DMA gaps, add pipeline_mode=pl.Buffered(3)
    #             to the input BlockSpecs.
    m_p, l_p, acc_p = pl.pallas_call(
        kernel,
        grid=(S, T),
        in_specs=[
            pl.BlockSpec((TB, D), in_map),
            pl.BlockSpec((TB, D), in_map),
        ],
        out_specs=(
            pl.BlockSpec((1, 1, 1), out_map),
            pl.BlockSpec((1, 1, 1), out_map),
            pl.BlockSpec((1, 1, D), out_map),
        ),
        out_shape=(
            jax.ShapeDtypeStruct((S, 1, 1), jnp.float32),   # running max m per split
            jax.ShapeDtypeStruct((S, 1, 1), jnp.float32),   # softmax denominator l per split
            jax.ShapeDtypeStruct((S, 1, D), jnp.float32),   # unnormalized weighted sum per split
        ),
        scratch_shapes=[
            pltpu.VMEM((1, 1), jnp.float32),
            pltpu.VMEM((1, 1), jnp.float32),
            pltpu.VMEM((1, D), jnp.float32),
        ],
        compiler_params=pltpu.CompilerParams(
            dimension_semantics=("parallel", "arbitrary")),
    )(tensor1, tensor2)

    # Merge per-split online-softmax partials (exact divide; trivial when S == 1).
    m_p = m_p.reshape(S, 1)
    l_p = l_p.reshape(S, 1)
    acc_p = acc_p.reshape(S, D)
    gm = jnp.max(m_p, axis=0, keepdims=True)       # (1, 1)
    scale = jnp.exp(m_p - gm)                      # (S, 1)  (empty splits -> exp(-1e30-gm) = 0)
    denom = jnp.sum(l_p * scale, axis=0)           # (1,)
    out = jnp.sum(acc_p * scale, axis=0) / denom   # (D,)
    return out.astype(in_dtype)


def _reference(tensor1, tensor2, dim):
    t1 = tensor1.astype(jnp.float32)
    t2 = tensor2.astype(jnp.float32)
    scores = jnp.sum(t1 * t2, axis=-1) / jnp.sqrt(jnp.float32(dim))   # (B,)
    w = jax.nn.softmax(scores, axis=0)                                # (B,)
    return (w @ t1 + w @ t2).astype(tensor1.dtype)                    # (D,)


if __name__ == "__main__":
    key = jax.random.PRNGKey(0)

    # Nominal small case from the module (single tile, single split).
    B, D = 8, 32
    k1, k2 = jax.random.split(key)
    tensor1 = jax.random.normal(k1, (B, D), dtype=jnp.float32)
    tensor2 = jax.random.normal(k2, (B, D), dtype=jnp.float32)

    fn = jax.jit(functools.partial(custom_attention_layer, dim=D))
    out = jax.block_until_ready(fn(tensor1, tensor2))
    ref = _reference(tensor1, tensor2, dim=D)
    assert out.shape == (D,)
    assert jnp.allclose(out, ref, atol=1e-4, rtol=1e-4), "mismatch vs reference (small case)"

    # Exercise the streamed multi-tile / multi-split / masked-tail path at a still-small size.
    B2, D2 = 40, 32
    k3, k4 = jax.random.split(k2)
    t1b = jax.random.normal(k3, (B2, D2), dtype=jnp.float32)
    t2b = jax.random.normal(k4, (B2, D2), dtype=jnp.float32)
    out2 = jax.block_until_ready(
        custom_attention_layer(t1b, t2b, dim=D2, block_rows=16, num_splits=2))
    ref2 = _reference(t1b, t2b, dim=D2)
    assert out2.shape == (D2,)
    assert jnp.allclose(out2, ref2, atol=1e-4, rtol=1e-4), "mismatch vs reference (tiled case)"

    print("KERNEL_OK")
</pallas_src>

<mosaic_0001>
module attributes {stable_mosaic.version = 11 : i64} {
  func.func @kernel(%arg0: i32, %arg1: i32, %arg2: memref<8x32xf32, #tpu.memory_space<vmem>>, %arg3: memref<8x32xf32, #tpu.memory_space<vmem>>, %arg4: memref<1x1x1xf32, #tpu.memory_space<vmem>>, %arg5: memref<1x1x1xf32, #tpu.memory_space<vmem>>, %arg6: memref<1x1x32xf32, #tpu.memory_space<vmem>>, %arg7: memref<1x1xf32, #tpu.memory_space<vmem>>, %arg8: memref<1x1xf32, #tpu.memory_space<vmem>>, %arg9: memref<1x32xf32, #tpu.memory_space<vmem>>) attributes {dimension_semantics = [#tpu.dimension_semantics<parallel>, #tpu.dimension_semantics<arbitrary>], iteration_bounds = array<i64: 1, 1>, scalar_prefetch = 0 : i64, scratch_operands = 3 : i64, tpu.core_type = #tpu.core_type<tc>, window_params = [{transform_indices = @transform_0, window_bounds = array<i64: 8, 32>}, {transform_indices = @transform_1, window_bounds = array<i64: 8, 32>}, {transform_indices = @transform_2, window_bounds = array<i64: 1, 1, 1>}, {transform_indices = @transform_3, window_bounds = array<i64: 1, 1, 1>}, {transform_indices = @transform_4, window_bounds = array<i64: 1, 1, 32>}]} {
    %c0_i32 = arith.constant 0 : i32
    %0 = arith.cmpi eq, %arg1, %c0_i32 : i32
    %1 = arith.extui %0 : i1 to i32
    %c0_i32_0 = arith.constant 0 : i32
    %2 = arith.cmpi ne, %1, %c0_i32_0 : i32
    scf.if %2 {
      %cst_26 = arith.constant -1.000000e+30 : f32
      %55 = vector.broadcast %cst_26 : f32 to vector<1x1xf32>
      %c0_27 = arith.constant 0 : index
      %c0_28 = arith.constant 0 : index
      %56 = vector.load %arg7[%c0_27, %c0_28] : memref<1x1xf32, #tpu.memory_space<vmem>>, vector<1x1xf32>
      tpu.vector_store %arg7[%c0_27, %c0_28], %55 {strides = array<i32>} : memref<1x1xf32, #tpu.memory_space<vmem>>, vector<1x1xf32>,
      %cst_29 = arith.constant 0.000000e+00 : f32
      %57 = vector.broadcast %cst_29 : f32 to vector<1x1xf32>
      %c0_30 = arith.constant 0 : index
      %c0_31 = arith.constant 0 : index
      %58 = vector.load %arg8[%c0_30, %c0_31] : memref<1x1xf32, #tpu.memory_space<vmem>>, vector<1x1xf32>
      tpu.vector_store %arg8[%c0_30, %c0_31], %57 {strides = array<i32>} : memref<1x1xf32, #tpu.memory_space<vmem>>, vector<1x1xf32>,
      %cst_32 = arith.constant 0.000000e+00 : f32
      %59 = vector.broadcast %cst_32 : f32 to vector<1x32xf32>
      %c0_33 = arith.constant 0 : index
      %c0_34 = arith.constant 0 : index
      %60 = vector.load %arg9[%c0_33, %c0_34] : memref<1x32xf32, #tpu.memory_space<vmem>>, vector<1x32xf32>
      tpu.vector_store %arg9[%c0_33, %c0_34], %59 {strides = array<i32>} : memref<1x32xf32, #tpu.memory_space<vmem>>, vector<1x32xf32>,
    } else {
    }
    %c0 = arith.constant 0 : index
    %c0_1 = arith.constant 0 : index
    %3 = vector.load %arg2[%c0, %c0_1] : memref<8x32xf32, #tpu.memory_space<vmem>>, vector<8x32xf32>
    %c0_2 = arith.constant 0 : index
    %c0_3 = arith.constant 0 : index
    %4 = vector.load %arg3[%c0_2, %c0_3] : memref<8x32xf32, #tpu.memory_space<vmem>>, vector<8x32xf32>
    %c1_i32 = arith.constant 1 : i32
    %5 = arith.muli %arg0, %c1_i32 : i32
    %6 = arith.addi %5, %arg1 : i32
    %c8_i32 = arith.constant 8 : i32
    %7 = arith.muli %6, %c8_i32 : i32
    %8 = tpu.iota {dimensions = array<i32: 0>} : vector<8x1xi32>
    %9 = vector.broadcast %7 : i32 to vector<8x1xi32>
    %10 = arith.addi %9, %8 : vector<8x1xi32>
    %c8_i32_4 = arith.constant 8 : i32
    %11 = vector.broadcast %c8_i32_4 : i32 to vector<8x1xi32>
    %12 = arith.cmpi slt, %10, %11 : vector<8x1xi32>
    %13 = arith.mulf %3, %4 : vector<8x32xf32>
    %cst = arith.constant dense<0.000000e+00> : vector<8xf32>
    %14 = vector.multi_reduction <add>, %13, %cst [1] : vector<8x32xf32> to vector<8xf32>
    %15 = vector.shape_cast %14 : vector<8xf32> to vector<8x1xf32>
    %cst_5 = arith.constant 0.176776692 : f32
    %16 = vector.broadcast %cst_5 : f32 to vector<8x1xf32>
    %17 = arith.mulf %15, %16 : vector<8x1xf32>
    %cst_6 = arith.constant -1.000000e+30 : f32
    %18 = vector.broadcast %cst_6 : f32 to vector<8x1xf32>
    %19 = arith.select %12, %17, %18 : vector<8x1xi1>, vector<8x1xf32>
    %c0_7 = arith.constant 0 : index
    %c0_8 = arith.constant 0 : index
    %20 = vector.load %arg7[%c0_7, %c0_8] : memref<1x1xf32, #tpu.memory_space<vmem>>, vector<1x1xf32>
    %cst_9 = arith.constant dense<0xFF800000> : vector<1xf32>
    %21 = vector.multi_reduction <maximumf>, %19, %cst_9 [0] : vector<8x1xf32> to vector<1xf32>
    %22 = vector.shape_cast %21 : vector<1xf32> to vector<1x1xf32>
    %23 = arith.maximumf %20, %22 : vector<1x1xf32>
    %24 = arith.subf %20, %23 : vector<1x1xf32>
    %25 = math.exp %24 : vector<1x1xf32>
    %26 = vector.broadcast %23 : vector<1x1xf32> to vector<8x1xf32>
    %27 = arith.subf %19, %26 : vector<8x1xf32>
    %28 = math.exp %27 : vector<8x1xf32>
    %cst_10 = arith.constant 0.000000e+00 : f32
    %29 = vector.broadcast %cst_10 : f32 to vector<8x1xf32>
    %30 = arith.select %12, %28, %29 : vector<8x1xi1>, vector<8x1xf32>
    %31 = arith.addf %3, %4 : vector<8x32xf32>
    %cst_11 = arith.constant 0.000000e+00 : f32
    %32 = vector.shape_cast %12 : vector<8x1xi1> to vector<8x1xi1>
    %33 = vector.broadcast %32 : vector<8x1xi1> to vector<8x32xi1>
    %34 = vector.broadcast %cst_11 : f32 to vector<8x32xf32>
    %35 = arith.select %33, %31, %34 : vector<8x32xi1>, vector<8x32xf32>
    %c0_12 = arith.constant 0 : index
    %c0_13 = arith.constant 0 : index
    %36 = vector.load %arg8[%c0_12, %c0_13] : memref<1x1xf32, #tpu.memory_space<vmem>>, vector<1x1xf32>
    %37 = arith.mulf %25, %36 : vector<1x1xf32>
    %cst_14 = arith.constant dense<0.000000e+00> : vector<1xf32>
    %38 = vector.multi_reduction <add>, %30, %cst_14 [0] : vector<8x1xf32> to vector<1xf32>
    %39 = vector.shape_cast %38 : vector<1xf32> to vector<1x1xf32>
    %40 = arith.addf %37, %39 : vector<1x1xf32>
    %c0_15 = arith.constant 0 : index
    %c0_16 = arith.constant 0 : index
    %41 = vector.load %arg8[%c0_15, %c0_16] : memref<1x1xf32, #tpu.memory_space<vmem>>, vector<1x1xf32>
    tpu.vector_store %arg8[%c0_15, %c0_16], %40 {strides = array<i32>} : memref<1x1xf32, #tpu.memory_space<vmem>>, vector<1x1xf32>,
    %c0_17 = arith.constant 0 : index
    %c0_18 = arith.constant 0 : index
    %42 = vector.load %arg9[%c0_17, %c0_18] : memref<1x32xf32, #tpu.memory_space<vmem>>, vector<1x32xf32>
    %43 = vector.broadcast %25 : vector<1x1xf32> to vector<1x32xf32>
    %44 = arith.mulf %43, %42 : vector<1x32xf32>
    %45 = vector.broadcast %30 : vector<8x1xf32> to vector<8x32xf32>
    %46 = arith.mulf %45, %35 : vector<8x32xf32>
    %cst_19 = arith.constant dense<0.000000e+00> : vector<32xf32>
    %47 = vector.multi_reduction <add>, %46, %cst_19 [0] : vector<8x32xf32> to vector<32xf32>
    %48 = vector.shape_cast %47 : vector<32xf32> to vector<1x32xf32>
    %49 = arith.addf %44, %48 : vector<1x32xf32>
    %c0_20 = arith.constant 0 : index
    %c0_21 = arith.constant 0 : index
    %50 = vector.load %arg9[%c0_20, %c0_21] : memref<1x32xf32, #tpu.memory_space<vmem>>, vector<1x32xf32>
    tpu.vector_store %arg9[%c0_20, %c0_21], %49 {strides = array<i32>} : memref<1x32xf32, #tpu.memory_space<vmem>>, vector<1x32xf32>,
    %c0_22 = arith.constant 0 : index
    %c0_23 = arith.constant 0 : index
    %51 = vector.load %arg7[%c0_22, %c0_23] : memref<1x1xf32, #tpu.memory_space<vmem>>, vector<1x1xf32>
    tpu.vector_store %arg7[%c0_22, %c0_23], %23 {strides = array<i32>} : memref<1x1xf32, #tpu.memory_space<vmem>>, vector<1x1xf32>,
    %c0_i32_24 = arith.constant 0 : i32
    %52 = arith.cmpi eq, %arg1, %c0_i32_24 : i32
    %53 = arith.extui %52 : i1 to i32
    %c0_i32_25 = arith.constant 0 : i32
    %54 = arith.cmpi ne, %53, %c0_i32_25 : i32
    scf.if %54 {
      %c0_26 = arith.constant 0 : index
      %c0_27 = arith.constant 0 : index
      %55 = vector.load %arg7[%c0_26, %c0_27] : memref<1x1xf32, #tpu.memory_space<vmem>>, vector<1x1xf32>
      %c0_28 = arith.constant 0 : index
      %c0_29 = arith.constant 0 : index
      %c0_30 = arith.constant 0 : index
      %56 = vector.load %arg4[%c0_28, %c0_29, %c0_30] : memref<1x1x1xf32, #tpu.memory_space<vmem>>, vector<1x1x1xf32>
      %57 = vector.shape_cast %56 : vector<1x1x1xf32> to vector<1x1xf32>
      %58 = vector.shape_cast %55 : vector<1x1xf32> to vector<1x1x1xf32>
      tpu.vector_store %arg4[%c0_28, %c0_29, %c0_30], %58 {strides = array<i32>} : memref<1x1x1xf32, #tpu.memory_space<vmem>>, vector<1x1x1xf32>,
      %c0_31 = arith.constant 0 : index
      %c0_32 = arith.constant 0 : index
      %59 = vector.load %arg8[%c0_31, %c0_32] : memref<1x1xf32, #tpu.memory_space<vmem>>, vector<1x1xf32>
      %c0_33 = arith.constant 0 : index
      %c0_34 = arith.constant 0 : index
      %c0_35 = arith.constant 0 : index
      %60 = vector.load %arg5[%c0_33, %c0_34, %c0_35] : memref<1x1x1xf32, #tpu.memory_space<vmem>>, vector<1x1x1xf32>
      %61 = vector.shape_cast %60 : vector<1x1x1xf32> to vector<1x1xf32>
      %62 = vector.shape_cast %59 : vector<1x1xf32> to vector<1x1x1xf32>
      tpu.vector_store %arg5[%c0_33, %c0_34, %c0_35], %62 {strides = array<i32>} : memref<1x1x1xf32, #tpu.memory_space<vmem>>, vector<1x1x1xf32>,
      %c0_36 = arith.constant 0 : index
      %c0_37 = arith.constant 0 : index
      %63 = vector.load %arg9[%c0_36, %c0_37] : memref<1x32xf32, #tpu.memory_space<vmem>>, vector<1x32xf32>
      %c0_38 = arith.constant 0 : index
      %c0_39 = arith.constant 0 : index
      %c0_40 = arith.constant 0 : index
      %64 = vector.load %arg6[%c0_38, %c0_39, %c0_40] : memref<1x1x32xf32, #tpu.memory_space<vmem>>, vector<1x1x32xf32>
      %65 = vector.shape_cast %64 : vector<1x1x32xf32> to vector<1x32xf32>
      %66 = vector.shape_cast %63 : vector<1x32xf32> to vector<1x1x32xf32>
      tpu.vector_store %arg6[%c0_38, %c0_39, %c0_40], %66 {strides = array<i32>} : memref<1x1x32xf32, #tpu.memory_space<vmem>>, vector<1x1x32xf32>,
    } else {
    }
    return
  }
  func.func @transform_0(%arg0: i32, %arg1: i32) -> (i32, i32) {
    %c1_i32 = arith.constant 1 : i32
    %0 = arith.muli %arg0, %c1_i32 : i32
    %1 = arith.addi %0, %arg1 : i32
    %c0_i32 = arith.constant 0 : i32
    %2 = arith.minsi %1, %c0_i32 : i32
    %c0_i32_0 = arith.constant 0 : i32
    %c0_i32_1 = arith.constant 0 : i32
    return %2, %c0_i32_0 : i32, i32
  }
  func.func @transform_1(%arg0: i32, %arg1: i32) -> (i32, i32) {
    %c1_i32 = arith.constant 1 : i32
    %0 = arith.muli %arg0, %c1_i32 : i32
    %1 = arith.addi %0, %arg1 : i32
    %c0_i32 = arith.constant 0 : i32
    %2 = arith.minsi %1, %c0_i32 : i32
    %c0_i32_0 = arith.constant 0 : i32
    %c0_i32_1 = arith.constant 0 : i32
    return %2, %c0_i32_0 : i32, i32
  }
  func.func @transform_2(%arg0: i32, %arg1: i32) -> (i32, i32, i32) {
    %c0_i32 = arith.constant 0 : i32
    %c0_i32_0 = arith.constant 0 : i32
    %c0_i32_1 = arith.constant 0 : i32
    return %arg0, %c0_i32, %c0_i32_0 : i32, i32, i32
  }
  func.func @transform_3(%arg0: i32, %arg1: i32) -> (i32, i32, i32) {
    %c0_i32 = arith.constant 0 : i32
    %c0_i32_0 = arith.constant 0 : i32
    %c0_i32_1 = arith.constant 0 : i32
    return %arg0, %c0_i32, %c0_i32_0 : i32, i32, i32
  }
  func.func @transform_4(%arg0: i32, %arg1: i32) -> (i32, i32, i32) {
    %c0_i32 = arith.constant 0 : i32
    %c0_i32_0 = arith.constant 0 : i32
    %c0_i32_1 = arith.constant 0 : i32
    return %arg0, %c0_i32, %c0_i32_0 : i32, i32, i32
  }
}

</mosaic_0001>

<bundles_post_ra>
// kernel: custom_attention_layer.1
= control target key start
LH: loop header
LB: loop body
LE: loop exit
PB: predicated region body
PF: predicated region fallthrough
CT: control target
= control target key end

     0   :  { %10 = vsyncpa [#allocation6], 0  ;;  %s412_s0 = inlined_call_operand.hbm [shape: f32[8,32], index: 0, kind: input, shape index: {}]   ;;  %s413_s1 = inlined_call_operand.hbm [shape: f32[8,32], index: 1, kind: input, shape index: {}]   ;;  %s414_s2 = inlined_call_operand.hbm [shape: f32[1,1,1], index: 2, kind: output, shape index: {0}]   ;;  %s415_s3 = inlined_call_operand.hbm [shape: f32[1,1,1], index: 3, kind: output, shape index: {1}]   ;;  %s416_s4 = inlined_call_operand.vmem [shape: f32[1,1,32], index: 4, kind: output, shape index: {2}]  }
   0x1   :  { %11 = vsyncpa [#allocation9], 0 }
   0x2   :  { %12 = vsyncpa [#allocation7], 0 }
   0x3   :  { %13 = vsyncpa [#allocation12], 0  ;;  %s303_s15 = smov [#allocation5]   ;;  %s304_s17 = smov [#allocation8]  }
   0x4   :  { %s25_s16 = sshll.u32 %s303_s15, 4  ;;  %s40_s18 = sshll.u32 %s304_s17, 4  ;;  %s26_s16 = int_to_ptr.vmem [resolvable:$true] %s25_s16  ;;  %s41_s18 = int_to_ptr.vmem [resolvable:$true] %s40_s18 }
   0x5   :  { %s207_s21 = scalar_lea.hbm %s412_s0, 128 }
   0x6   :  { %p208_p0 = scmp.ne.s32.totalorder %s412_s0, %s207_s21  ;;  %p211_p1 = scmp.lt.u32.totalorder %s207_s21, %s412_s0 }
   0x8   :  { %p213_p2 = pnand %p211_p1, %p208_p0 }
   0xa   :  { %216 = shalt.err (!%p213_p2)
}
   0xb   :  { %s217_s26 = scalar_lea.vmem %s26_s16, 128  ;;  %p222_p4 = scmp.lt.s32.totalorder %s26_s16, %s26_s16 }
   0xc   :  { %p218_p3 = scmp.ne.s32.totalorder %s26_s16, %s217_s26  ;;  %p223_p5 = scmp.lt.s32.totalorder %s217_s26, %s217_s26 }
   0xe   :  { %p224_p6 = por %p223_p5, %p222_p4 }
  0x10   :  { %p225_p7 = pnand %p224_p6, %p218_p3 }
  0x12   :  { %228 = shalt.err (!%p225_p7)
}
  0x13   :  { %28 = dma.hbm_to_vmem [thread:$0]  %s412_s0, 128, %s26_s16, [#allocation6]  }
  0x14   :  { %s229_s5 = scalar_lea.hbm %s413_s1, 128 }
  0x15   :  { %p230_p8 = scmp.ne.s32.totalorder %s413_s1, %s229_s5  ;;  %p233_p9 = scmp.lt.u32.totalorder %s229_s5, %s413_s1 }
  0x17   :  { %p235_p10 = pnand %p233_p9, %p230_p8 }
  0x19   :  { %238 = shalt.err (!%p235_p10)
}
  0x1a   :  { %s239_s10 = scalar_lea.vmem %s41_s18, 128  ;;  %p244_p12 = scmp.lt.s32.totalorder %s41_s18, %s41_s18 }
  0x1b   :  { %p240_p11 = scmp.ne.s32.totalorder %s41_s18, %s239_s10  ;;  %p245_p13 = scmp.lt.s32.totalorder %s239_s10, %s239_s10 }
  0x1d   :  { %p246_p0 = por %p245_p13, %p244_p12 }
  0x1f   :  { %p247_p1 = pnand %p246_p0, %p240_p11 }
  0x21   :  { %250 = shalt.err (!%p247_p1)
}
  0x22   :  { %43 = dma.hbm_to_vmem [thread:$0]  %s413_s1, 128, %s41_s18, [#allocation9]  }
  0x23   :  { %295 = dma.done.wait [#allocation6], 128  }
  0x24   :  { %296 = vsyncadd [#allocation6], 4294967168 }
  0x25   :  { %297 = dma.done.wait [#allocation9], 128  }
  0x26   :  { %298 = vsyncadd [#allocation9], 4294967168  ;;  %vm60_vm0 = vcmask 0   ;;  %v305_v0 = vmov -1e+30   ;;  %v360_v1 = vld [vmem:[#allocation5] sm:$0xff]  ;;  %v93_v10 = vlaneseq }
  0x27   :  { %61 = vst.msk [vmem:[#allocation2] sm:$0x1] %vm60_vm0, %v305_v0  ;;  %v362_v2 = vld [vmem:[#allocation8] sm:$0xff]  ;;  %vm75_vm1 = vcmask 261120   ;;  %v306_v5 = vmov 0.0   ;;  %v307_v6 = vmov 0  }
  0x28   :  { %v74_v3 = vmul.f32 %v362_v2, %v360_v1  ;;  %62 = vst.msk [vmem:[#allocation3] sm:$0x1] %vm60_vm0, %v306_v5  ;;  %202 = vset.pattern.permute.xlu1 %v307_v6  ;;  %201 = vset.pattern.permute.xlu0 %v307_v6  ;;  %vm63_vm2 = vcmask 253952   ;;  %v369_v13 = vshrl.u32 %v93_v10, 7  ;;  %vm108_vm3 = vcmask 7168   ;;  %s308_s1 = smov [#allocation10]  }
  0x29   :  { %64 = vst.msk [vmem:[#allocation4] sm:$0x1] %vm63_vm2, %v306_v5  ;;  %s162_s12 = sshll.u32 %s308_s1, 4  ;;  %s309_s13 = smov [#allocation11]   ;;  %s163_s12 = int_to_ptr.vmem [resolvable:$true] %s162_s12 }
  0x2a   :  { %v76_v4 = vsel %vm75_vm1, %v74_v3, 0.0  ;;  %v95_v17 = vsub.s32 0, %v369_v13  ;;  %s172_s14 = sshll.u32 %s309_s13, 4  ;;  %s251_s15 = scalar_lea.vmem %s163_s12, 16  ;;  %s173_s14 = int_to_ptr.vmem [resolvable:$true] %s172_s14 }
  0x2b   :  { %77 = vadd.xlane.f32.xlu0 %v76_v4  ;;  %p252_p2 = scmp.ne.s32.totalorder %s163_s12, %s251_s15  ;;  %s255_s16 = scalar_lea.vmem %s163_s12, 32 }
  0x2c   :  { %p256_p3 = scmp.lt.s32.totalorder %s163_s12, %s163_s12  ;;  %p257_p4 = scmp.lt.s32.totalorder %s255_s16, %s251_s15 }
  0x2e   :  { %v81_v16 = vld [vmem:[#allocation2] sm:$0x1]  ;;  %p258_p5 = por %p257_p4, %p256_p3 }
  0x2f   :  { %v106_v33 = vld [vmem:[#allocation3] sm:$0x1] }
  0x30   :  { %p259_p6 = pnand %p258_p5, %p252_p2 }
  0xb8   :  { %v78_v7 = vpop.xlane.xlu0 %77 }
  0xb9   :  { %v79_v8 = vmul.f32 0.17677669, %v78_v7 }
  0xbb   :  { %v82_v9 = vrot.slane %v79_v8, 4 }
  0xbd   :  { %v83_v11 = vmax.f32 %v79_v8, %v82_v9 }
  0xbf   :  { %v84_v12 = vrot.slane %v83_v11, 2 }
  0xc1   :  { %v85_v14 = vmax.f32 %v83_v11, %v84_v12 }
  0xc3   :  { %v86_v15 = vrot.slane %v85_v14, 1 }
  0xc5   :  { %v87_v18 = vmax.f32 %v85_v14, %v86_v15 }
  0xc7   :  { %v88_v19 = vmax.f32 %v81_v16, %v87_v18 }
  0xc9   :  { %v96_v20 = vrot.slane %v88_v19, %v95_v17  ;;  %146 = vst.msk [vmem:[#allocation2] sm:$0x1] %vm60_vm0, %v88_v19  ;;  %v89_v21 = vsub.f32 %v81_v16, %v88_v19 }
  0xcb   :  { %v98_v22 = vsub.f32 %v79_v8, %v96_v20  ;;  %v90_v23 = vmul.f32 1.442695, %v89_v21 }
  0xcd   :  { %v99_v24 = vmul.f32 1.442695, %v98_v22  ;;  %203 = vpow2.f32 %v90_v23 }
  0xcf   :  { %205 = vpow2.f32 %v99_v24 }
  0xd0   :  { %v150_v25 = vld [vmem:[#allocation2] sm:$0x1] }
  0xd1   :  { %151 = vst.msk [vmem:[#allocation10] sm:$0x1] %vm60_vm0, %v150_v25 }
  0xd7   :  { %v204_v26 = vpop.eup %203 }
  0xd8   :  { %122 = vperm.xlu1 %202, %v204_v26   ;;  %v107_v36 = vmul.f32 %v204_v26, %v106_v33 }
  0xd9   :  { %v206_v27 = vpop.eup %205 }
  0xda   :  { %v109_v28 = vsel %vm108_vm3, %v206_v27, 0.0  ;;  %132 = vperm.xlu0 %201, %v206_v27  }
  0xdb   :  { %v110_v29 = vrot.slane %v109_v28, 4 }
  0xdd   :  { %v111_v30 = vadd.f32 %v110_v29, %v109_v28 }
  0xdf   :  { %v112_v31 = vrot.slane %v111_v30, 2 }
  0xe1   :  { %v113_v32 = vadd.f32 %v112_v31, %v111_v30 }
  0xe3   :  { %v114_v34 = vrot.slane %v113_v32, 1 }
  0xe5   :  { %v115_v35 = vadd.f32 %v114_v34, %v113_v32 }
  0xe7   :  { %v116_v37 = vadd.f32 %v115_v35, %v107_v36 }
  0xe9   :  { %118 = vst.msk [vmem:[#allocation3] sm:$0x1] %vm60_vm0, %v116_v37 }
  0xf0   :  { %v152_v38 = vld [vmem:[#allocation3] sm:$0x1] }
  0xf1   :  { %153 = vst.msk [vmem:[#allocation11] sm:$0x1] %vm60_vm0, %v152_v38 }
  0xf2   :  { %262 = shalt.err (!%p259_p6)
}
  0xf3   :  { %s263_s19 = scalar_lea.hbm %s414_s2, 16 }
  0xf4   :  { %p264_p7 = scmp.ne.s32.totalorder %s414_s2, %s263_s19  ;;  %p267_p8 = scmp.lt.u32.totalorder %s263_s19, %s414_s2 }
  0xf6   :  { %p269_p9 = pnand %p267_p8, %p264_p7 }
  0xf8   :  { %272 = shalt.err (!%p269_p9)
}
  0xf9   :  { %165 = dma.vmem_to_hbm [thread:$0]  %s163_s12, 16, %s414_s2, [#allocation7]  }
  0xfa   :  { %s273_s26 = scalar_lea.vmem %s173_s14, 16  ;;  %s277_s27 = scalar_lea.vmem %s173_s14, 32 }
  0xfb   :  { %p274_p10 = scmp.ne.s32.totalorder %s173_s14, %s273_s26  ;;  %p278_p11 = scmp.lt.s32.totalorder %s173_s14, %s173_s14 }
  0xfc   :  { %p279_p12 = scmp.lt.s32.totalorder %s277_s27, %s273_s26 }
  0xfe   :  { %p280_p13 = por %p279_p12, %p278_p11 }
 0x100   :  { %p281_p0 = pnand %p280_p13, %p274_p10 }
 0x102   :  { %284 = shalt.err (!%p281_p0)
}
 0x103   :  { %s285_s30 = scalar_lea.hbm %s415_s3, 16 }
 0x104   :  { %p286_p1 = scmp.ne.s32.totalorder %s415_s3, %s285_s30  ;;  %p289_p2 = scmp.lt.u32.totalorder %s285_s30, %s415_s3 }
 0x106   :  { %p291_p3 = pnand %p289_p2, %p286_p1 }
 0x108   :  { %294 = shalt.err (!%p291_p3)
}
 0x109   :  { %175 = dma.vmem_to_hbm [thread:$0]  %s173_s14, 16, %s415_s3, [#allocation12]   ;;  %v102_v39 = vadd.f32 %v362_v2, %v360_v1  ;;  %v119_v49 = vld [vmem:[#allocation4] sm:$0x1] }
 0x157   :  { %v123_v45 = vpop.permute.xlu1 %122 }
 0x158   :  { %v128_v47 = vrot.slane %v123_v45, %v95_v17 }
 0x159   :  { %v133_v40 = vpop.permute.xlu0 %132 }
 0x15a   :  { %v135_v41 = vmul.f32 %v133_v40, %v102_v39  ;;  %v129_v51 = vmul.f32 %v128_v47, %v119_v49 }
 0x15c   :  { %v136_v42 = vsel %vm75_vm1, %v135_v41, 0.0 }
 0x15d   :  { %v137_v43 = vrot.slane %v136_v42, 4 }
 0x15f   :  { %v138_v44 = vadd.f32 %v137_v43, %v136_v42 }
 0x161   :  { %v139_v46 = vrot.slane %v138_v44, 2 }
 0x163   :  { %v140_v48 = vadd.f32 %v139_v46, %v138_v44 }
 0x165   :  { %v141_v50 = vrot.slane %v140_v48, 1 }
 0x167   :  { %v142_v52 = vadd.f32 %v141_v50, %v140_v48 }
 0x169   :  { %v143_v53 = vadd.f32 %v142_v52, %v129_v51 }
 0x16b   :  { %145 = vst.msk [vmem:[#allocation4] sm:$0x1] %vm63_vm2, %v143_v53 }
 0x172   :  { %v154_v54 = vld [vmem:[#allocation4] sm:$0x1] }
 0x173   :  { %155 = vst.msk [vmem:[%s416_s4] sm:$0x1] %vm63_vm2, %v154_v54 }
 0x174   :  { %299 = dma.done.wait [#allocation7], 16  }
 0x175   :  { %300 = vsyncadd [#allocation7], 4294967280 }
 0x176   :  { %301 = dma.done.wait [#allocation12], 16  }
 0x177   :  { %302 = vsyncadd [#allocation12], 4294967280 }
 0x178   :  { %186 = vsyncpa [#allocation6], 1 }
 0x179   :  { %187 = vsyncpa [#allocation9], 1 }
 0x17a   :  { %188 = vsyncpa [#allocation7], 1 }
 0x17b   :  { %189 = vsyncpa [#allocation12], 1 }

</bundles_post_ra>
